<compile_context>
chip_gen: v6e
topology: v6e:2x2x1
jax: 0.10.0
libtpu: 0.0.40
codegen_flags: <defaults>
</compile_context>

<pallas_src>
import functools

import jax
import jax.numpy as jnp
from jax.experimental import pallas as pl
from jax.experimental.pallas import tpu as pltpu


def _round_up(x, m):
    return ((x + m - 1) // m) * m


def _outconv_kernel(x_ref, w_ref, b_ref, o_ref, *, bn):
    # x_ref: (bn, Cin, ts)  w_ref: (Cout, Cin)  b_ref: (Cout, 1)  o_ref: (bn, Cout, ts)
    w = w_ref[...]
    b = b_ref[...]
    for i in range(bn):  # static unroll over the batch sub-block
        acc = jnp.dot(w, x_ref[i], preferred_element_type=jnp.float32)
        o_ref[i] = (acc + b).astype(o_ref.dtype)


def outconv_pallas(x_nchw, weight, bias, *, target_step_bytes=1 << 20):
    """1x1 Conv2d forward, NCHW-native.

    x_nchw: (N, C_in, H, W)
    weight: (C_out, C_in, 1, 1)   (PyTorch conv weight layout)
    bias:   (C_out,)
    returns (N, C_out, H, W)
    """
    N, Cin, H, W = x_nchw.shape
    Cout = weight.shape[0]
    S = H * W
    dtype = x_nchw.dtype
    itemsize = jnp.dtype(dtype).itemsize

    # Free reshapes only: spatial stays the minor (lane) axis, no transposes.
    x3d = x_nchw.reshape(N, Cin, S)       # (N, Cin, S)
    w2d = weight.reshape(Cout, Cin)       # (Cout, Cin)
    b2d = bias.reshape(Cout, 1)           # (Cout, 1): lane-broadcast bias

    # ---- per-step byte budget, accounting for (8,128) sublane padding ------
    sub = (8 * 4) // itemsize             # sublanes per vreg row: 8 f32, 16 bf16
    cin_pad = _round_up(Cin, sub)
    cout_pad = _round_up(Cout, sub)
    bytes_per_lane = (cin_pad + cout_pad) * itemsize   # in + out per lane column

    s_ceil = _round_up(S, 128)
    ts = (target_step_bytes // bytes_per_lane // 128) * 128
    ts = int(max(128, min(ts, s_ceil)))   # lane-dense, multiple of 128

    # If one spatial tile swallows the image, block several batch images per
    # grid step so per-step bytes still approach the target.
    bn = 1
    if ts >= s_ceil and N > 1:
        per_image = bytes_per_lane * ts
        bn = int(max(1, min(N, target_step_bytes // max(per_image, 1))))
        if bn >= N:
            # Keep >=2 batch blocks for a possible 2-core split; costs at most
            # one extra ~0.35 us grid step.
            bn = max(1, (N + 1) // 2)

    grid = (pl.cdiv(N, bn), pl.cdiv(S, ts))
    # Partial trailing blocks (batch or spatial) are handled by Pallas itself:
    # OOB reads are undefined garbage, OOB writeback is dropped -> no wrapper
    # pad/slice, no extra HBM passes.

    # VMEM: double-buffered, sublane-padded input+output tiles + tiny params,
    # with 2x headroom; never below the smallest default scoped limit.
    needed = 2 * bn * (cin_pad + cout_pad) * ts * itemsize + (64 << 10)
    vmem_limit = int(min(max(2 * needed, 16 << 20), 48 << 20))

    cost = pl.CostEstimate(
        flops=2 * N * Cout * Cin * S,
        transcendentals=0,
        bytes_accessed=(N * (Cin + Cout) * S + Cout * Cin + Cout) * itemsize,
    )

    out3d = pl.pallas_call(
        functools.partial(_outconv_kernel, bn=bn),
        out_shape=jax.ShapeDtypeStruct((N, Cout, S), dtype),
        grid_spec=pltpu.PrefetchScalarGridSpec(
            num_scalar_prefetch=0,
            grid=grid,
            in_specs=[
                pl.BlockSpec((bn, Cin, ts), lambda nb, sb: (nb, 0, sb)),
                pl.BlockSpec((Cout, Cin), lambda nb, sb: (0, 0)),   # weight, VMEM-resident
                pl.BlockSpec((Cout, 1), lambda nb, sb: (0, 0)),     # bias,   VMEM-resident
            ],
            out_specs=pl.BlockSpec((bn, Cout, ts), lambda nb, sb: (nb, 0, sb)),
        ),
        compiler_params=pltpu.CompilerParams(
            dimension_semantics=("parallel", "parallel"),
            vmem_limit_bytes=vmem_limit,
        ),
        cost_estimate=cost,
    )(x3d, w2d, b2d)

    return out3d.reshape(N, Cout, H, W)


def _reference(x_nchw, weight, bias):
    # Pure-JAX reference: 1x1 conv == einsum over the channel dim + bias.
    w2d = weight.reshape(weight.shape[0], weight.shape[1])  # (Cout, Cin)
    y = jnp.einsum("nchw,oc->nohw", x_nchw, w2d)
    return y + bias[None, :, None, None]


if __name__ == "__main__":
    key = jax.random.PRNGKey(0)
    kx, kw, kb = jax.random.split(key, 3)

    N, Cin, Cout, H, W = 2, 4, 2, 16, 16

    x = jax.random.normal(kx, (N, Cin, H, W), dtype=jnp.float32)
    # Deterministic synthetic params (shapes per nn.Conv2d(in, out, 1)):
    weight = jax.random.normal(kw, (Cout, Cin, 1, 1), dtype=jnp.float32) * 0.5
    bias = jax.random.normal(kb, (Cout,), dtype=jnp.float32) * 0.1

    out = outconv_pallas(x, weight, bias)
    out = jax.block_until_ready(out)

    ref = _reference(x, weight, bias)
    assert out.shape == (N, Cout, H, W)
    assert jnp.allclose(out, ref, atol=1e-5, rtol=1e-5), "mismatch vs reference"

    print("KERNEL_OK")
</pallas_src>

<mosaic_0001>
module attributes {stable_mosaic.version = 11 : i64} {
  func.func @_outconv_kernel(%arg0: i32, %arg1: i32, %arg2: memref<1x4x256xf32, #tpu.memory_space<vmem>>, %arg3: memref<2x4xf32, #tpu.memory_space<vmem>>, %arg4: memref<2x1xf32, #tpu.memory_space<vmem>>, %arg5: memref<1x2x256xf32, #tpu.memory_space<vmem>>) attributes {dimension_semantics = [#tpu.dimension_semantics<parallel>, #tpu.dimension_semantics<parallel>], iteration_bounds = array<i64: 2, 1>, scalar_prefetch = 0 : i64, scratch_operands = 0 : i64, tpu.core_type = #tpu.core_type<tc>, window_params = [{transform_indices = @transform_0, window_bounds = array<i64: 1, 4, 256>}, {pipeline_mode = #tpu.pipeline_mode<synchronous>, transform_indices = @transform_1, window_bounds = array<i64: 2, 4>}, {pipeline_mode = #tpu.pipeline_mode<synchronous>, transform_indices = @transform_2, window_bounds = array<i64: 2, 1>}, {transform_indices = @transform_3, window_bounds = array<i64: 1, 2, 256>}]} {
    %c0 = arith.constant 0 : index
    %c0_0 = arith.constant 0 : index
    %0 = vector.load %arg3[%c0, %c0_0] : memref<2x4xf32, #tpu.memory_space<vmem>>, vector<2x4xf32>
    %c0_1 = arith.constant 0 : index
    %c0_2 = arith.constant 0 : index
    %1 = vector.load %arg4[%c0_1, %c0_2] : memref<2x1xf32, #tpu.memory_space<vmem>>, vector<2x1xf32>
    %c0_3 = arith.constant 0 : index
    %c0_4 = arith.constant 0 : index
    %c0_5 = arith.constant 0 : index
    %2 = vector.load %arg2[%c0_3, %c0_4, %c0_5] : memref<1x4x256xf32, #tpu.memory_space<vmem>>, vector<1x4x256xf32>
    %3 = vector.shape_cast %2 : vector<1x4x256xf32> to vector<4x256xf32>
    %cst = arith.constant dense<0.000000e+00> : vector<2x256xf32>
    %4 = tpu.matmul %0, %3, %cst {dimension_numbers = #tpu.dot_dimension_numbers<[1], [0], [0], [1], [0, 0, 1, 1], [], []>} : vector<2x4xf32>, vector<4x256xf32>, vector<2x256xf32> -> vector<2x256xf32>
    %5 = vector.broadcast %1 : vector<2x1xf32> to vector<2x256xf32>
    %6 = arith.addf %4, %5 : vector<2x256xf32>
    %c0_6 = arith.constant 0 : index
    %c0_7 = arith.constant 0 : index
    %c0_8 = arith.constant 0 : index
    %7 = vector.load %arg5[%c0_6, %c0_7, %c0_8] : memref<1x2x256xf32, #tpu.memory_space<vmem>>, vector<1x2x256xf32>
    %8 = vector.shape_cast %7 : vector<1x2x256xf32> to vector<2x256xf32>
    %9 = vector.shape_cast %6 : vector<2x256xf32> to vector<1x2x256xf32>
    tpu.vector_store %arg5[%c0_6, %c0_7, %c0_8], %9 {strides = array<i32>} : memref<1x2x256xf32, #tpu.memory_space<vmem>>, vector<1x2x256xf32>,
    return
  }
  func.func @transform_0(%arg0: i32, %arg1: i32) -> (i32, i32, i32) {
    %c0_i32 = arith.constant 0 : i32
    %c0_i32_0 = arith.constant 0 : i32
    return %arg0, %c0_i32, %arg1 : i32, i32, i32
  }
  func.func @transform_1(%arg0: i32, %arg1: i32) -> (i32, i32) {
    %c0_i32 = arith.constant 0 : i32
    %c0_i32_0 = arith.constant 0 : i32
    %c0_i32_1 = arith.constant 0 : i32
    return %c0_i32, %c0_i32_0 : i32, i32
  }
  func.func @transform_2(%arg0: i32, %arg1: i32) -> (i32, i32) {
    %c0_i32 = arith.constant 0 : i32
    %c0_i32_0 = arith.constant 0 : i32
    %c0_i32_1 = arith.constant 0 : i32
    return %c0_i32, %c0_i32_0 : i32, i32
  }
  func.func @transform_3(%arg0: i32, %arg1: i32) -> (i32, i32, i32) {
    %c0_i32 = arith.constant 0 : i32
    %c0_i32_0 = arith.constant 0 : i32
    return %arg0, %c0_i32, %arg1 : i32, i32, i32
  }
}

</mosaic_0001>

<bundles_post_ra>
// kernel: tpu_custom_call.1
= control target key start
LH: loop header
LB: loop body
LE: loop exit
PB: predicated region body
PF: predicated region fallthrough
CT: control target
= control target key end

     0   :  { %8 = vsyncpa [#allocation3], 0  ;;  %s772_s0 = inlined_call_operand.hbm [shape: f32[2,4,256], index: 0, kind: input, shape index: {}]   ;;  %s773_s1 = inlined_call_operand.vmem [shape: f32[2,4], index: 1, kind: input, shape index: {}]   ;;  %s774_s2 = inlined_call_operand.vmem [shape: f32[2,1], index: 2, kind: input, shape index: {}]   ;;  %s775_s3 = inlined_call_operand.hbm [shape: f32[2,2,256], index: 3, kind: output, shape index: {}]  }
   0x1   :  { %10 = vsyncpa [#allocation3 + $0x1], 0 }
   0x2   :  { %11 = vsyncpa [#allocation4], 0 }
   0x3   :  { %13 = vsyncpa [#allocation4 + $0x1], 0  ;;  %s631_s12 = smov 0   ;;  %s633_s13 = smov 0  }
   0x4   :  { %s635_s14 = smov 0   ;;  %s637_s15 = smov 0  }
   0x5   :  { %s639_s16 = smov 0   ;;  %s641_s17 = smov 0  }
   0x6 LB: > { %s410_s18 = sadd.s32 4294967295, %s605_s17   ;;  %s411_s19 = sadd.s32 4294967294, %s605_s17   ;;  %s605_s17 = sphi %s641_s17, %s19_s17   ;;  %s601_s16 = sphi %s639_s16, %s787_s16   ;;  %s597_s15 = sphi %s637_s15, %s786_s15   ;;  %s593_s14 = sphi %s635_s14, %s785_s14   ;;  %s589_s13 = sphi %s633_s13, %s784_s13   ;;  %s585_s12 = sphi %s631_s12, %s783_s12  }
   0x7   : > { %s31_s20 = sadd.s32 1, %s601_s16  ;;  %s40_s21 = sadd.s32 1, %s593_s14 }
   0x8   : > { %p33_p0 = scmp.ge.s32.totalorder %s31_s20, 2  ;;  %p47_p1 = scmp.ne.s32.totalorder %s593_s14, %s589_s13 }
   0x9   : > { %p48_p2 = scmp.eq.s32.totalorder %s605_s17, 0  ;;  %p53_p3 = scmp.ne.s32.totalorder %s589_s13, %s585_s12 }
   0xa   : > { %s789_s20 = smov (%p33_p0, %s31_s20), 0  ;;  %p54_p5 = scmp.eq.s32.totalorder %s410_s18, 0 }
   0xb   : > { %p672_p4 = por %p48_p2, %p47_p1  ;;  %s35_s23 = ssub.s32 %s601_s16, %s789_s20 }
   0xc   : > { %p121_p6 = scmp.eq.s32.totalorder %s410_s18, 1  ;;  %p38_p7 = scmp.eq.s32.totalorder %s35_s23, 0 }
   0xd   : > { %p678_p8 = por %p54_p5, %p53_p3  ;;  %p127_p10 = scmp.eq.s32.totalorder %s411_s19, 1 }
   0xe   : > { %p682_p9 = por %p121_p6, %p47_p1  ;;  %p443_p13 = scmp.lt.s32.totalorder %s605_s17, 2 }
   0xf   : > { %s687_s26 = scalar_select %p38_p7, %s593_s14, %s40_s21  }
  0x10   : > { %p689_p11 = por %p127_p10, %p53_p3  ;;  %s153_s28 = sand.u32 1, %s593_s14  }
  0x11   : > { %s414_s29 = sshll.u32 %s153_s28, 3  ;;  %s429_s30 = sshll.u32 %s601_s16, 7 }
  0x12   : > { %s779_s27 = scalar_select %p689_p11, 1, 0 }
  0x13   : > { %s165_s6 = scalar_lea.hbm %s772_s0, %s429_s30  ;;  %s157_s7 = scalar_lea.vmem [#allocation2], %s414_s29 }
  0x14   : > { %s167_s8 = sshll.u32 %s157_s7, 4  ;;  %p702_p0 = pnand %p443_p13, %p672_p4  ;;  %s168_s8 = int_to_ptr.vmem [resolvable:$true] %s167_s8 }
  0x15   : > { %p417_p1 = scmp.ge.s32.totalorder %s605_s17, 1  ;;  %p172_p2 = scmp.lt.s32.totalorder %s605_s17, 3 }
  0x16   : > { %s154_s10 = scalar_lea.sflag [#allocation3], %s153_s28  ;;  %p499_p3 = pneg %p702_p0 }
  0x17   : > { %s510_s11 = scalar_lea.vmem %s168_s8, 128  ;;  %s607_s18 = smov [#allocation2]  }
  0x18   : > { %p511_p5 = scmp.ne.s32.totalorder %s168_s8, %s510_s11  ;;  %s515_s19 = sshll.u32 %s607_s18, 4  ;;  %s516_s19 = int_to_ptr.vmem [resolvable:$false] %s515_s19 }
  0x19   : > { %s517_s21 = scalar_lea.vmem %s516_s19, 256  ;;  %p518_p10 = scmp.lt.s32.totalorder %s168_s8, %s516_s19 }
  0x1a   : > { %p513_p6 = pnand %p511_p5, %p499_p3  ;;  %p519_p12 = scmp.lt.s32.totalorder %s517_s21, %s510_s11 }
  0x1c   : > { %p514_p7 = pneg %p513_p6  ;;  %p520_p4 = por %p519_p12, %p518_p10 }
  0x1e   : > { %p521_p13 = pnand %p520_p4, %p514_p7 }
  0x20   : > { %524 = shalt.err (!%p521_p13)
}
  0x21   : > { %438 = dma.hbm_to_vmem [thread:$0]  (!%p702_p0), %s165_s6, 128, %s168_s8, %s154_s10  }
  0x22   : > { %p173_p11 = pnand %p417_p1, %p172_p2 }
  0x23   : > { %s717_s22 = sand.u32 (!%p173_p11), 1, %s589_s13  }
  0x24   : > { %176 = sbr.rel (%p173_p11) target bundleno = 259 (0x103), region = 32  ;;  %s418_s23 = sshll.u32 (!%p173_p11), %s717_s22, 3 }
  0x25   : > { %s179_s28 = scalar_lea.sflag (!%p173_p11), [#allocation3], %s717_s22  ;;  %s182_s29 = scalar_lea.vmem (!%p173_p11), [#allocation2], %s418_s23 }
  0x29   : > { %576 = dma.done.wait (%p678_p8), %s179_s28, 128  }
  0x2a   : > { %578 = vsyncadd (%p678_p8), %s179_s28, 4294967168  ;;  %v608_v0 = vmov 0.0   ;;  %v609_v1 = vmov 0   ;;  %v209_v2 = vld [vmem:[%s182_s29] sm:$0xff]  ;;  %vm221_vm0 = vcmask 1043456   ;;  %vm217_vm1 = vcmask 31744  }
  0x2b   : > { %290 = vmatprep.mubr.f32.mxu0 %v608_v0  ;;  %495 = vset.pattern.permute.xlu0 %v609_v1  ;;  %v208_v3 = vld [vmem:[%s774_s2] sm:$0x3]  ;;  %v216_v4 = vcombine.high %v209_v2, %v209_v2  ;;  %s419_s24 = sshll.u32 %s717_s22, 2  ;;  %s430_s7 = sshll.u32 %s597_s15, 6 }
  0x2c   : > { %212 = vperm.xlu0 %495, %v208_v3   ;;  %v207_v5 = vld [vmem:[%s773_s1] sm:$0x3]  ;;  %s204_s8 = scalar_lea.vmem [#allocation5], %s419_s24  ;;  %s324_s18 = scalar_lea.hbm %s775_s3, %s430_s7 }
  0x2d   : > { %420 = vmatprep.subr.msk.mxu0 %vm221_vm0, %v216_v4  ;;  %s326_s9 = sshll.u32 %s204_s8, 4  ;;  %s310_s19 = scalar_lea.sflag [#allocation4], %s717_s22  ;;  %s327_s9 = int_to_ptr.vmem [resolvable:$true] %s326_s9 }
  0x2e   : > { %421 = vmatpush1.msk.msra.mxu0 %vm221_vm0, %v209_v2  ;;  %s525_s21 = scalar_lea.vmem %s327_s9, 64  ;;  %s610_s23 = smov [#allocation5]  }
  0x2f   : > { %422 = vmatmul.mubr.msk.f32.vlgmr.msra.gmra.mxu0 %vm217_vm1, %v207_v5  ;;  %p526_p8 = scmp.ne.s32.totalorder %s327_s9, %s525_s21  ;;  %s529_s28 = sshll.u32 %s610_s23, 4  ;;  %s530_s28 = int_to_ptr.vmem [resolvable:$false] %s529_s28 }
  0x30   : > { %s531_s15 = scalar_lea.vmem %s530_s28, 128  ;;  %p532_p0 = scmp.lt.s32.totalorder %s327_s9, %s530_s28 }
  0x31   : > { %p527_p11 = pnand %p526_p8, %p682_p9  ;;  %p533_p1 = scmp.lt.s32.totalorder %s531_s15, %s525_s21 }
  0x33   : > { %p528_p12 = pneg %p527_p11  ;;  %p534_p2 = por %p533_p1, %p532_p0 }
  0x35   : > { %p535_p3 = pnand %p534_p2, %p528_p12 }
  0xa7   : > { %v213_v6 = vpop.permute.xlu0 %212 }
  0xef   : > { %v292_v7 = vpop.f32.mrf.mxu0 }
  0xf0   : > { %v293_v9 = vadd.f32 %v292_v7, %v213_v6 }
  0xf1   : > { %v294_v8 = vpop.f32.mrf.mxu0 }
  0xf2   : > { %v295_v10 = vadd.f32 %v294_v8, %v213_v6 }
  0xf4   : > { %v299_v11 = vcombine.low %v293_v9, %v295_v10 }
  0xf6   : > { %423 = vst.sshfl [vmem:[%s204_s8] sm:$0x33 pattern:$0x76325410] %v299_v11 }
  0xf7   : > { %538 = shalt.err (!%p535_p3)
}
  0xf8   : > { %s539_s29 = scalar_lea.hbm %s324_s18, 64  ;;  %s543_s4 = scalar_lea.hbm %s775_s3, 128 }
  0xf9   : > { %p540_p5 = scmp.ne.s32.totalorder %s324_s18, %s539_s29  ;;  %p544_p10 = scmp.lt.s32.totalorder %s324_s18, %s775_s3 }
  0xfa   : > { %p545_p4 = scmp.lt.s32.totalorder %s543_s4, %s539_s29 }
  0xfb   : > { %p541_p6 = pnand %p540_p5, %p682_p9 }
  0xfc   : > { %p546_p13 = por %p545_p4, %p544_p10 }
  0xfd   : > { %p542_p7 = pneg %p541_p6 }
  0xff   : > { %p547_p8 = pnand %p546_p13, %p542_p7 }
 0x101   : > { %550 = shalt.err (!%p547_p8)
}
 0x102   : > { %433 = dma.vmem_to_hbm [thread:$0]  (%p682_p9), %s327_s9, 64, %s324_s18, %s310_s19  }
 0x103 PF: > { %s338_s24 = sand.u32 1, %s585_s12   ;;  %p781_p11 = scmp.ne.s32.totalorder %s779_s27, 0 }
 0x104   : > { %p782_p12 = scmp.ge.s32.totalorder %s605_s17, 2  ;;  %s339_s7 = scalar_lea.sflag [#allocation4], %s338_s24 }
 0x106   : > { %p440_p0 = pnand %p782_p12, %p781_p11 }
 0x108   : > { %p441_p1 = pneg %p440_p0 }
 0x10a   : > { %580 = dma.done.wait (%p441_p1), %s339_s7, 64  }
 0x10b   : > { %582 = vsyncadd (%p441_p1), %s339_s7, 4294967232  ;;  %s19_s17 = sadd.s32 1, %s605_s17   ;;  %s783_s12 = smov %s589_s13 }
 0x10c   : > { %p16_p2 = scmp.ge.s32.totalorder %s19_s17, 4   ;;  %s784_s13 = smov %s593_s14 }
 0x10d   : > { %s785_s14 = smov %s687_s26  ;;  %s786_s15 = smov %s601_s16 }
 0x10e   : > { %s787_s16 = smov %s789_s20  ;;  %18 = sbr.rel (!%p16_p2) target bundleno = 6 (0x6), region = 77 }
 0x113   :  { %344 = vsyncpa [#allocation3], 1 }
 0x114   :  { %346 = vsyncpa [#allocation3 + $0x1], 1 }
 0x115   :  { %347 = vsyncpa [#allocation4], 1 }
 0x116   :  { %349 = vsyncpa [#allocation4 + $0x1], 1 }

</bundles_post_ra>
